<compile_context>
chip_gen: v5e
topology: v5e:2x2
jax: 0.10.0
libtpu: 0.0.40
codegen_flags: <defaults>
</compile_context>

<pallas_src>
import jax
import jax.numpy as jnp
from jax.experimental import pallas as pl
from jax.experimental.pallas import tpu as pltpu


# Conservative per-block keys budget.  Pallas double-buffers each input, and
# the default scoped-VMEM limit is 16 MiB on v5e (32 MiB on v6e/v7x, with only
# 64 MiB physical on v7x).  4 MiB keys blocks (8 MiB double-buffered) leave
# headroom on every generation.
_KEYS_BLOCK_BYTES = 4 * 1024 * 1024


def _bilinear_attention_body(q_ref, w_ref, k_ref, o_ref, m_ref=None):
    # weighted_query = query @ W  -> (B, M)   [single small MXU matmul]
    wq = jnp.dot(q_ref[...], w_ref[...], preferred_element_type=jnp.float32)

    # scores[b, s] = <keys[b, s, :], wq[b, :]>  -> (B, S)
    # VPU broadcast-multiply + XLU lane reduction; avoids B unit-row MXU
    # matmuls (near-zero systolic-array fill + MRF pop latency).
    scores = jnp.sum(k_ref[...] * wq[:, None, :], axis=-1)

    if m_ref is not None:
        # Single vselect on the bool/int mask; -1e30 matches torch
        # masked_softmax semantics (fully-masked rows -> uniform weights).
        scores = jnp.where(m_ref[...] != 0, scores, -1e30)

    # Softmax over S (lane axis).
    mx = jnp.max(scores, axis=-1, keepdims=True)
    e = jnp.exp(scores - mx)
    denom = jnp.sum(e, axis=-1, keepdims=True)
    # approx reciprocal lowers to the EUP slot (idle after exp) -> the divide
    # is effectively free versus a VALU division.
    o_ref[...] = (e * pl.reciprocal(denom, approx=True)).astype(o_ref.dtype)


def _bilinear_attention_masked_kernel(q_ref, w_ref, k_ref, m_ref, o_ref):
    _bilinear_attention_body(q_ref, w_ref, k_ref, o_ref, m_ref=m_ref)


def _bilinear_attention_unmasked_kernel(q_ref, w_ref, k_ref, o_ref):
    _bilinear_attention_body(q_ref, w_ref, k_ref, o_ref)


def _pick_block_b(B, S, M, itemsize):
    """Largest batch tile whose keys block fits the conservative VMEM budget."""
    row_bytes = max(1, S * M * itemsize)
    tb = _KEYS_BLOCK_BYTES // row_bytes
    if tb >= B:
        return B  # whole problem fits: gridless, no per-step overhead
    # Keep (tb, V) / (tb, S) blocks sublane-aligned (multiples of 8).
    return max(8, (tb // 8) * 8)


def bilinear_attention(query, weight, keys, mask=None, *, block_b=None):
    """query: (B, V) f32, weight: (V, M) f32, keys: (B, S, M) f32,
    mask: (B, S) bool or None.  Returns (B, S) f32 attention weights.

    block_b: optional batch tile.  If None it is chosen automatically; when it
    covers the whole batch the kernel runs gridless, otherwise a grid over B
    with "parallel" semantics is used (shards across v7x TensorCores).
    """
    B, V = query.shape
    Bk, S, M = keys.shape
    assert Bk == B, "query/keys batch mismatch"

    out_shape = jax.ShapeDtypeStruct((B, S), jnp.float32)
    if block_b is None:
        block_b = _pick_block_b(B, S, M, jnp.dtype(keys.dtype).itemsize)

    kernel = (_bilinear_attention_masked_kernel if mask is not None
              else _bilinear_attention_unmasked_kernel)

    if block_b >= B:
        # Tiny / VMEM-resident problem: single invocation, whole-array blocks.
        vmem = pl.BlockSpec(memory_space=pltpu.MemorySpace.VMEM)
        args = [query, weight, keys]
        in_specs = [vmem, vmem, vmem]
        if mask is not None:
            args.append(mask)           # bool, DMA'd as-is (i8 bytes)
            in_specs.append(vmem)
        return pl.pallas_call(
            kernel,
            out_shape=out_shape,
            in_specs=in_specs,
            out_specs=vmem,
        )(*args)

    # Scaled path: tile the batch, keys block (TB, S, M) under the VMEM budget.
    tb = int(block_b)
    grid = (pl.cdiv(B, tb),)
    in_specs = [
        pl.BlockSpec((tb, V), lambda i: (i, 0)),
        pl.BlockSpec((V, M), lambda i: (0, 0)),      # resident across steps
        pl.BlockSpec((tb, S, M), lambda i: (i, 0, 0)),
    ]
    args = [query, weight, keys]
    if mask is not None:
        in_specs.append(pl.BlockSpec((tb, S), lambda i: (i, 0)))
        args.append(mask)
    return pl.pallas_call(
        kernel,
        out_shape=out_shape,
        grid=grid,
        in_specs=in_specs,
        out_specs=pl.BlockSpec((tb, S), lambda i: (i, 0)),
        compiler_params=pltpu.CompilerParams(
            dimension_semantics=("parallel",),
        ),
    )(*args)


def _reference(query, weight, keys, mask):
    wq = query @ weight                                   # (B, M)
    scores = jnp.einsum("bsm,bm->bs", keys, wq)           # (B, S)
    if mask is not None:
        scores = scores - (~mask).astype(jnp.float32) * 1e30
    return jax.nn.softmax(scores, axis=-1)


if __name__ == "__main__":
    # Small shapes consistent with the module's forward:
    #   vector_dim = matrix_dim = 32, batch = 2, seq_len = 8
    B, V, M, S = 2, 32, 32, 8

    key = jax.random.PRNGKey(0)
    k_q, k_k, k_w, k_m = jax.random.split(key, 4)

    query = jax.random.normal(k_q, (B, V), dtype=jnp.float32)
    keys = jax.random.normal(k_k, (B, S, M), dtype=jnp.float32)

    # Deterministic xavier_uniform-style init for weight (V, M)
    bound = (6.0 / (V + M)) ** 0.5
    weight = jax.random.uniform(
        k_w, (V, M), minval=-bound, maxval=bound, dtype=jnp.float32
    )

    # Boolean mask: True = valid position (at least one valid per row)
    mask = jax.random.bernoulli(k_m, p=0.7, shape=(B, S))
    mask = mask.at[:, 0].set(True)

    out_masked = jax.block_until_ready(bilinear_attention(query, weight, keys, mask))
    out_nomask = jax.block_until_ready(bilinear_attention(query, weight, keys, None))

    ref_masked = _reference(query, weight, keys, mask)
    ref_nomask = _reference(query, weight, keys, None)

    assert out_masked.shape == (B, S)
    assert out_nomask.shape == (B, S)
    # Tolerance relaxed slightly for the EUP approx reciprocal.
    assert jnp.allclose(out_masked, ref_masked, atol=2e-3, rtol=2e-3), "masked mismatch"
    assert jnp.allclose(out_nomask, ref_nomask, atol=2e-3, rtol=2e-3), "unmasked mismatch"

    # Also exercise the tiled (grid over B, "parallel") path at a modestly
    # larger, lane-dense (S multiple of 128) shape to validate the scaled
    # code path end-to-end.
    B2, V2, M2, S2 = 16, 32, 64, 128
    k_q2, k_k2, k_w2, k_m2 = jax.random.split(jax.random.PRNGKey(1), 4)
    query2 = jax.random.normal(k_q2, (B2, V2), dtype=jnp.float32)
    keys2 = jax.random.normal(k_k2, (B2, S2, M2), dtype=jnp.float32)
    bound2 = (6.0 / (V2 + M2)) ** 0.5
    weight2 = jax.random.uniform(
        k_w2, (V2, M2), minval=-bound2, maxval=bound2, dtype=jnp.float32
    )
    mask2 = jax.random.bernoulli(k_m2, p=0.7, shape=(B2, S2))
    mask2 = mask2.at[:, 0].set(True)

    out_tiled = jax.block_until_ready(
        bilinear_attention(query2, weight2, keys2, mask2, block_b=8)
    )
    ref_tiled = _reference(query2, weight2, keys2, mask2)
    assert out_tiled.shape == (B2, S2)
    assert jnp.allclose(out_tiled, ref_tiled, atol=2e-3, rtol=2e-3), "tiled mismatch"

    print("KERNEL_OK")
</pallas_src>

<mosaic_0001>
module attributes {stable_mosaic.version = 11 : i64} {
  func.func @_bilinear_attention_masked_kernel(%arg0: memref<2x32xf32, #tpu.memory_space<vmem>>, %arg1: memref<32x32xf32, #tpu.memory_space<vmem>>, %arg2: memref<2x8x32xf32, #tpu.memory_space<vmem>>, %arg3: memref<2x8xi32, #tpu.memory_space<vmem>>, %arg4: memref<2x8xf32, #tpu.memory_space<vmem>>) attributes {dimension_semantics = [], scalar_prefetch = 0 : i64, scratch_operands = 0 : i64, tpu.core_type = #tpu.core_type<tc>} {
    %c0 = arith.constant 0 : index
    %c0_0 = arith.constant 0 : index
    %0 = vector.load %arg0[%c0, %c0_0] : memref<2x32xf32, #tpu.memory_space<vmem>>, vector<2x32xf32>
    %c0_1 = arith.constant 0 : index
    %c0_2 = arith.constant 0 : index
    %1 = vector.load %arg1[%c0_1, %c0_2] : memref<32x32xf32, #tpu.memory_space<vmem>>, vector<32x32xf32>
    %cst = arith.constant dense<0.000000e+00> : vector<2x32xf32>
    %2 = tpu.matmul %0, %1, %cst {dimension_numbers = #tpu.dot_dimension_numbers<[1], [0], [0], [1], [0, 0, 1, 1], [], []>} : vector<2x32xf32>, vector<32x32xf32>, vector<2x32xf32> -> vector<2x32xf32>
    %c0_3 = arith.constant 0 : index
    %c0_4 = arith.constant 0 : index
    %c0_5 = arith.constant 0 : index
    %3 = vector.load %arg2[%c0_3, %c0_4, %c0_5] : memref<2x8x32xf32, #tpu.memory_space<vmem>>, vector<2x8x32xf32>
    %4 = vector.shape_cast %2 : vector<2x32xf32> to vector<2x1x32xf32>
    %5 = vector.broadcast %4 : vector<2x1x32xf32> to vector<2x8x32xf32>
    %6 = arith.mulf %3, %5 : vector<2x8x32xf32>
    %cst_6 = arith.constant dense<0.000000e+00> : vector<2x8xf32>
    %7 = vector.multi_reduction <add>, %6, %cst_6 [2] : vector<2x8x32xf32> to vector<2x8xf32>
    %c0_7 = arith.constant 0 : index
    %c0_8 = arith.constant 0 : index
    %8 = vector.load %arg3[%c0_7, %c0_8] : memref<2x8xi32, #tpu.memory_space<vmem>>, vector<2x8xi32>
    %cst_9 = arith.constant dense<0> : vector<2x8xi32>
    %9 = arith.cmpi ne, %8, %cst_9 : vector<2x8xi32>
    %10 = arith.extui %9 : vector<2x8xi1> to vector<2x8xi32>
    %c0_i32 = arith.constant 0 : i32
    %11 = vector.broadcast %c0_i32 : i32 to vector<2x8xi32>
    %12 = arith.cmpi ne, %10, %11 : vector<2x8xi32>
    %cst_10 = arith.constant -1.000000e+30 : f32
    %13 = vector.broadcast %cst_10 : f32 to vector<2x8xf32>
    %14 = arith.select %12, %7, %13 : vector<2x8xi1>, vector<2x8xf32>
    %cst_11 = arith.constant dense<0xFF800000> : vector<2xf32>
    %15 = vector.multi_reduction <maximumf>, %14, %cst_11 [1] : vector<2x8xf32> to vector<2xf32>
    %16 = vector.shape_cast %15 : vector<2xf32> to vector<2x1xf32>
    %17 = vector.broadcast %16 : vector<2x1xf32> to vector<2x8xf32>
    %18 = arith.subf %14, %17 : vector<2x8xf32>
    %19 = math.exp %18 : vector<2x8xf32>
    %cst_12 = arith.constant dense<0.000000e+00> : vector<2xf32>
    %20 = vector.multi_reduction <add>, %19, %cst_12 [1] : vector<2x8xf32> to vector<2xf32>
    %21 = vector.shape_cast %20 : vector<2xf32> to vector<2x1xf32>
    %22 = tpu.reciprocal %21 {approx = true} : vector<2x1xf32> -> vector<2x1xf32>
    %23 = vector.broadcast %22 : vector<2x1xf32> to vector<2x8xf32>
    %24 = arith.mulf %19, %23 : vector<2x8xf32>
    %c0_13 = arith.constant 0 : index
    %c0_14 = arith.constant 0 : index
    %25 = vector.load %arg4[%c0_13, %c0_14] : memref<2x8xf32, #tpu.memory_space<vmem>>, vector<2x8xf32>
    tpu.vector_store %arg4[%c0_13, %c0_14], %24 {strides = array<i32>} : memref<2x8xf32, #tpu.memory_space<vmem>>, vector<2x8xf32>,
    return
  }
}

</mosaic_0001>

<bundles_post_ra>
// kernel: tpu_custom_call.1
= control target key start
LH: loop header
LB: loop body
LE: loop exit
PB: predicated region body
PF: predicated region fallthrough
CT: control target
= control target key end

     0   :  { %9 = vsyncpa [#allocation3], 0  ;;  %s274_s0 = inlined_call_operand.vmem [shape: f32[2,32], index: 0, kind: input, shape index: {}]   ;;  %s275_s1 = inlined_call_operand.hbm [shape: f32[32,32], index: 1, kind: input, shape index: {}]   ;;  %s276_s2 = inlined_call_operand.hbm [shape: f32[2,8,32], index: 2, kind: input, shape index: {}]   ;;  %s277_s3 = inlined_call_operand.vmem [shape: s32[2,8], index: 3, kind: input, shape index: {}]   ;;  %s278_s4 = inlined_call_operand.hbm [shape: f32[2,8], index: 4, kind: output, shape index: {}]  }
   0x1   :  { %10 = vsyncpa [#allocation6], 0 }
   0x2   :  { %11 = vsyncpa [#allocation4], 0  ;;  %s18_s17 = sshll.u32 %s275_s1, 4  ;;  %s226_s18 = smov [#allocation2]   ;;  %s19_s17 = int_to_ptr.hbm [resolvable:$true] %s18_s17 }
   0x3   :  { %s20_s19 = sshll.u32 %s226_s18, 4  ;;  %s31_s22 = sshll.u32 %s276_s2, 4  ;;  %s21_s19 = int_to_ptr.vmem [resolvable:$true] %s20_s19  ;;  %s32_s22 = int_to_ptr.hbm [resolvable:$true] %s31_s22 }
   0x4   :  { %s227_s23 = smov 128   ;;  %s228_s24 = smov 8  }
   0x5   :  { %26 = dma.hbm_to_vmem [thread:$0]  %s19_s17, 512, %s21_s19, [#allocation3], %s227_s23, %s227_s23, %s228_s24  }
   0x6   :  { %s229_s25 = smov [#allocation5]  }
   0x7   :  { %s33_s26 = sshll.u32 %s229_s25, 4  ;;  %s34_s26 = int_to_ptr.vmem [resolvable:$true] %s33_s26 }
   0x8   :  { %39 = dma.hbm_to_vmem [thread:$0]  %s32_s22, 256, %s34_s26, [#allocation6], %s227_s23, %s227_s23, %s228_s24  }
   0x9   :  { %220 = dma.done.wait [#allocation3], 512  }
   0xa   :  { %221 = vsyncadd [#allocation3], 4294966784 }
   0xb   :  { %222 = dma.done.wait [#allocation6], 256  }
   0xc   :  { %223 = vsyncadd [#allocation6], 4294967040  ;;  %v54_v0 = vld [vmem:[#allocation2 + $0x18] sm:$0xff]  ;;  %v53_v1 = vld [vmem:[#allocation2 + $0x10] sm:$0xff]  ;;  %vm55_vm0 = vcmask 261120   ;;  %v99_v16 = vlaneseq  ;;  %vm103_vm1 = vcmask 1041409  }
   0xd   :  { %71 = vmatpush.msra.mxu0 %v54_v0  ;;  %v52_v2 = vld [vmem:[#allocation2 + $0x8] sm:$0xff]  ;;  %v51_v3 = vld [vmem:[#allocation2] sm:$0xff]  ;;  %vm107_vm3 = vcmask 58368   ;;  %s127_s5 = sshll.u32 %s278_s4, 4  ;;  %s128_s5 = int_to_ptr.hbm [resolvable:$true] %s127_s5 }
   0xe   :  { %v50_v4 = vld [vmem:[%s274_s0] sm:$0x3]  ;;  %v80_v12 = vld [vmem:[#allocation5 + $0x8] sm:$0xff]  ;;  %v100_v17 = vand.u32 127, %v99_v16 }
   0xf   :  { %72 = vmatpush.msra.mxu0 %v53_v1  ;;  %v79_v6 = vld [vmem:[#allocation5] sm:$0xff] }
  0x10   :  { %v95_v18 = vld [vmem:[%s277_s3] sm:$0x3]  ;;  %s230_s3 = smov [#allocation7]  }
  0x11   :  { %73 = vmatpush.msra.mxu0 %v52_v2  ;;  %vm96_vm2 = vcmp.ne.s32.totalorder %v95_v18, 0  ;;  %s125_s28 = sshll.u32 %s230_s3, 4  ;;  %s126_s28 = int_to_ptr.vmem [resolvable:$true] %s125_s28 }
  0x13   :  { %74 = vmatpush.msra.mxu0 %v51_v3 }
  0x14   :  { %138 = vmatmul.msk.f32.vlgmr.msra.gmra.mxu0 %vm55_vm0, %v50_v4 }
  0x91   :  { %v76_v5 = vpop.f32.mrf.mxu0 }
  0x92   :  { %v82_v7 = vrot.slane %v76_v5, 1  ;;  %v83_v8 = vperm.slane %v76_v5, 0 }
  0x94   :  { %v87_v9 = vmul.f32 %v83_v8, %v79_v6  ;;  %v84_v10 = vperm.slane %v82_v7, 0 }
  0x96   :  { %v89_v11 = vsel %vm55_vm0, %v87_v9, 0.0  ;;  %v88_v13 = vmul.f32 %v84_v10, %v80_v12 }
  0x97   :  { %90 = vadd.xlane.f32.xlu0 %v89_v11 }
  0x98   :  { %v92_v14 = vsel %vm55_vm0, %v88_v13, 0.0 }
  0x9f   :  { %93 = vadd.xlane.f32.xlu0 %v92_v14 }
 0x10a   :  { %v91_v15 = vpop.xlane.xlu0 %90 }
 0x10b   :  { %v101_v20 = vperm.slane %v91_v15, %v100_v17 }
 0x112   :  { %v94_v19 = vpop.xlane.xlu0 %93 }
 0x113   :  { %v102_v21 = vperm.slane %v94_v19, %v100_v17 }
 0x115   :  { %v104_v22 = vsel %vm103_vm1, %v102_v21, %v101_v20 }
 0x116   :  { %v106_v23 = vsel %vm96_vm2, %v104_v22, -1e+30 }
 0x117   :  { %v108_v24 = vsel %vm107_vm3, %v106_v23, -inf }
 0x118   :  { %109 = vmax.xlane.f32.xlu1 %v108_v24 }
 0x18b   :  { %v110_v25 = vpop.xlane.xlu1 %109 }
 0x18c   :  { %v111_v26 = vsub.f32 %v106_v23, %v110_v25 }
 0x18e   :  { %v112_v27 = vmul.f32 1.442695, %v111_v26 }
 0x190   :  { %144 = vpow2.f32 %v112_v27 }
 0x196   :  { %v145_v28 = vpop.eup %144 }
 0x197   :  { %v114_v29 = vsel %vm107_vm3, %v145_v28, 0.0 }
 0x198   :  { %115 = vadd.xlane.f32.xlu1 %v114_v29 }
 0x20b   :  { %v116_v30 = vpop.xlane.xlu1 %115 }
 0x20c   :  { %146 = vrcp.f32 %v116_v30 }
 0x212   :  { %v147_v31 = vpop.eup %146 }
 0x213   :  { %v118_v32 = vmul.f32 %v147_v31, %v145_v28 }
 0x215   :  { %119 = vst.msk [vmem:[#allocation7] sm:$0x3] %vm107_vm3, %v118_v32 }
 0x216   :  { %130 = dma.vmem_to_hbm [thread:$0]  %s126_s28, 32, %s128_s5, [#allocation4]  }
 0x217   :  { %224 = dma.done.wait [#allocation4], 32  }
 0x218   :  { %225 = vsyncadd [#allocation4], 4294967264 }
 0x219   :  { %135 = vsyncpa [#allocation3], 1 }
 0x21a   :  { %136 = vsyncpa [#allocation6], 1 }
 0x21b   :  { %137 = vsyncpa [#allocation4], 1 }

</bundles_post_ra>
